<compile_context>
chip_gen: v5e
topology: v5e:2x2
jax: 0.10.0
libtpu: 0.0.40
codegen_flags: <defaults>
</compile_context>

<pallas_src>
import functools

import jax
import jax.numpy as jnp
from jax.experimental import pallas as pl
from jax.experimental.pallas import tpu as pltpu

_MIB = 1 << 20


def _round_up(a, b):
    return ((a + b - 1) // b) * b


def _pick_tile(total, desired, align):
    """Largest `align`-multiple tile <= desired that evenly divides `total`
    (so no forward-time padding is needed).  Falls back to a clamped aligned
    tile (forward pads) when `total` itself is not `align`-aligned."""
    desired = max(align, (desired // align) * align)
    if total <= desired:
        return _round_up(total, align)
    if total % align == 0:
        v = desired
        while v > align:
            if total % v == 0:
                return v
            v -= align
        return align
    return desired


def _tpu_hw():
    """(vmem_capacity_bytes, tensorcores) with conservative fallbacks that are
    safe on every generation (assume v7x-like 64 MiB VMEM, single core)."""
    vmem_cap = 64 * _MIB
    num_cores = 1
    try:
        info = pltpu.get_tpu_info()
        vmem_cap = int(getattr(info, "vmem_capacity_bytes", vmem_cap))
        for attr in ("num_cores", "core_count", "num_tensorcores",
                     "tensorcores_per_chip", "tensor_core_count"):
            val = getattr(info, attr, None)
            if val:
                num_cores = int(val)
                break
    except Exception:
        pass
    return vmem_cap, num_cores


def _linear_kernel_f32_out(x_ref, wT_ref, o_ref):
    """f32 output: accumulate directly into the resident output block (no scratch)."""
    @pl.when(pl.program_id(2) == 0)
    def _():
        o_ref[...] = jnp.zeros_like(o_ref)

    o_ref[...] += jnp.dot(x_ref[...], wT_ref[...], preferred_element_type=jnp.float32)


def _linear_kernel_acc(x_ref, wT_ref, o_ref, acc_ref):
    """Low-precision output: f32 VMEM accumulator, cast + store on the last K step."""
    @pl.when(pl.program_id(2) == 0)
    def _():
        acc_ref[...] = jnp.zeros_like(acc_ref)

    acc_ref[...] += jnp.dot(x_ref[...], wT_ref[...], preferred_element_type=jnp.float32)

    @pl.when(pl.program_id(2) == pl.num_programs(2) - 1)
    def _():
        o_ref[...] = acc_ref[...].astype(o_ref.dtype)


@functools.partial(jax.jit, static_argnames=("out_features", "tm", "tn", "tk"))
def linear_forward(x, w_t, *, out_features=None, tm=None, tn=None, tk=None):
    """x: (..., in_features); w_t: (in_features_padded, out_features_padded).

    w_t is the weight pre-transposed (and zero-padded) once at parameter creation
    (see init_linear_params); the math is identical to PyTorch's y = x @ W.T with
    W of shape (out, in).  `out_features` slices off init-time padding of N.
    """
    KK, NN = w_t.shape                   # stored (possibly pre-padded) dims
    K = x.shape[-1]                      # true in_features
    assert K <= KK, (x.shape, w_t.shape)
    N = NN if out_features is None else out_features
    assert N <= NN

    lead_shape = x.shape[:-1]
    M = 1
    for d in lead_shape:
        M *= d
    x2d = x.reshape(M, K)

    out_dtype = x.dtype
    x_item = jnp.dtype(x.dtype).itemsize
    w_item = jnp.dtype(w_t.dtype).itemsize
    o_item = jnp.dtype(out_dtype).itemsize
    need_acc = jnp.dtype(out_dtype) != jnp.dtype(jnp.float32)

    # ---- generation-aware tile selection -----------------------------------
    vmem_cap, num_cores = _tpu_hw()
    budget = max(12 * _MIB, min((2 * vmem_cap) // 5, 56 * _MIB))
    vmem_limit = int(max(32 * _MIB, min((3 * vmem_cap) // 4, 2 * budget + 16 * _MIB)))

    # Sublane packing: 8 rows/vreg for 4-byte dtypes, 16 for bf16, 32 for 1-byte.
    sublane = max(8, 32 // x_item)

    tm_ = _pick_tile(M, tm if tm is not None else 1024, sublane)
    tn_ = _pick_tile(NN, tn if tn is not None else 1024, 128)
    tk_ = _pick_tile(KK, tk if tk is not None else 2048, 128)

    def working_set(a, b, c):
        s = 2 * a * c * x_item + 2 * c * b * w_item + 2 * a * b * o_item
        if need_acc:
            s += a * b * 4
        return s

    # Shrink (K first: it does not change HBM arithmetic intensity) until the
    # double-buffered tiles fit the per-generation VMEM budget.
    while working_set(tm_, tn_, tk_) > budget:
        if tk_ > 256:
            tk_ = _pick_tile(KK, tk_ // 2, 128)
        elif tn_ > 256:
            tn_ = _pick_tile(NN, tn_ // 2, 128)
        elif tm_ > 8 * sublane:
            tm_ = _pick_tile(M, tm_ // 2, sublane)
        else:
            break

    # Decode-like shapes on 2-TensorCore chips (v7x): keep >=2 parallel N blocks
    # so both cores get work.  Skipped on single-core chips (v5e/v6e) where it
    # would only add grid-step overhead and halve x reuse.
    if num_cores >= 2 and M <= tm_ and NN > 256 and tn_ >= NN:
        half_align = 256 if NN >= 512 else 128
        tn_ = _pick_tile(NN, _round_up((NN + 1) // 2, half_align), 128)

    Mp = _round_up(M, tm_)
    Kp = _round_up(KK, tk_)
    Np = _round_up(NN, tn_)

    # x is per-call data: pad only when tiles / the pre-padded weight demand it.
    # The weight is re-padded here only as a fallback for weights that were NOT
    # produced by init_linear_params (zero-padding K is exact for the dot).
    if (Mp, Kp) != (M, K):
        x2d = jnp.pad(x2d, ((0, Mp - M), (0, Kp - K)))
    if (Kp, Np) != (KK, NN):
        w_t = jnp.pad(w_t, ((0, Kp - KK), (0, Np - NN)))

    grid = (Mp // tm_, Np // tn_, Kp // tk_)

    if need_acc:
        kernel = _linear_kernel_acc
        scratch_shapes = [pltpu.VMEM((tm_, tn_), jnp.float32)]
    else:
        kernel = _linear_kernel_f32_out
        scratch_shapes = []

    # Real streaming traffic: x is re-read once per N tile, W once per M tile.
    cost = pl.CostEstimate(
        flops=2 * Mp * Kp * Np,
        transcendentals=0,
        bytes_accessed=(Mp * Kp * x_item * (Np // tn_)
                        + Kp * Np * w_item * (Mp // tm_)
                        + Mp * Np * o_item),
    )

    out_pad = pl.pallas_call(
        kernel,
        out_shape=jax.ShapeDtypeStruct((Mp, Np), out_dtype),
        grid_spec=pltpu.PrefetchScalarGridSpec(
            num_scalar_prefetch=0,
            grid=grid,
            in_specs=[
                pl.BlockSpec((tm_, tk_), lambda i, j, k: (i, k)),
                pl.BlockSpec((tk_, tn_), lambda i, j, k: (k, j)),
            ],
            out_specs=pl.BlockSpec((tm_, tn_), lambda i, j, k: (i, j)),
            scratch_shapes=scratch_shapes,
        ),
        compiler_params=pltpu.CompilerParams(
            dimension_semantics=("parallel", "parallel", "arbitrary"),
            vmem_limit_bytes=vmem_limit,
        ),
        cost_estimate=cost,
    )(x2d, w_t)

    out = out_pad[:M, :N]
    return out.reshape(*lead_shape, N)


def init_linear_params(key, in_features, out_features, dtype=jnp.float32, pad_align=128):
    """Matches nn.init.trunc_normal_(mean=0, std=sigma, a=-3*sigma, b=3*sigma).

    Returns the weight PRE-TRANSPOSED to (in_features, out_features) and
    PRE-PADDED with zeros to lane-aligned multiples, so the jitted forward pass
    never re-transposes or re-pads it (the K x N HBM copy happens exactly once,
    at parameter creation).
    """
    sigma = (2.0 / (in_features + out_features)) ** 0.5
    w = jax.random.truncated_normal(
        key, lower=-3.0, upper=3.0,
        shape=(out_features, in_features), dtype=jnp.float32,
    ) * sigma
    w_t = jnp.asarray(w.T, dtype=dtype)
    kp = _round_up(in_features, pad_align)
    np_ = _round_up(out_features, pad_align)
    if (kp, np_) != (in_features, out_features):
        w_t = jnp.pad(w_t, ((0, kp - in_features), (0, np_ - out_features)))
    return w_t


if __name__ == "__main__":
    key = jax.random.PRNGKey(0)
    k_w, k_x, k_w2, k_x2 = jax.random.split(key, 4)

    # Small shapes consistent with the module: (batch, seq, in) -> (batch, seq, out).
    batch, seq, in_features, out_features = 2, 8, 32, 64
    w_t = init_linear_params(k_w, in_features, out_features)
    x = jax.random.normal(k_x, (batch, seq, in_features), dtype=jnp.float32)

    y = jax.block_until_ready(linear_forward(x, w_t, out_features=out_features))
    y_ref = jnp.einsum("...i,io->...o", x, w_t[:in_features, :out_features])
    assert y.shape == (batch, seq, out_features)
    assert jnp.allclose(y, y_ref, atol=1e-5, rtol=1e-5)

    # Non-tile-multiple K/N (exercises init-time padding + f32 in-place accumulation).
    K2, N2 = 640, 320
    w_t2 = init_linear_params(k_w2, K2, N2)
    x2 = jax.random.normal(k_x2, (3, 128, K2), dtype=jnp.float32)
    y2 = jax.block_until_ready(linear_forward(x2, w_t2, out_features=N2))
    y2_ref = jnp.einsum("...i,io->...o", x2, w_t2[:K2, :N2])
    assert y2.shape == (3, 128, N2)
    assert jnp.allclose(y2, y2_ref, atol=1e-4, rtol=1e-4)

    # bf16 path (f32 VMEM accumulator scratch, cast on the final K step).
    y3 = jax.block_until_ready(
        linear_forward(x2.astype(jnp.bfloat16), w_t2.astype(jnp.bfloat16),
                       out_features=N2)
    )
    assert y3.dtype == jnp.bfloat16
    assert jnp.allclose(y3.astype(jnp.float32), y2_ref, atol=3e-1, rtol=3e-2)

    print("KERNEL_OK")
</pallas_src>

<mosaic_0001>
module attributes {stable_mosaic.version = 11 : i64} {
  func.func @_linear_kernel_f32_out(%arg0: i32, %arg1: i32, %arg2: i32, %arg3: memref<16x128xf32, #tpu.memory_space<vmem>>, %arg4: memref<128x128xf32, #tpu.memory_space<vmem>>, %arg5: memref<16x128xf32, #tpu.memory_space<vmem>>) attributes {dimension_semantics = [#tpu.dimension_semantics<parallel>, #tpu.dimension_semantics<parallel>, #tpu.dimension_semantics<arbitrary>], iteration_bounds = array<i64: 1, 1, 1>, scalar_prefetch = 0 : i64, scratch_operands = 0 : i64, tpu.core_type = #tpu.core_type<tc>, window_params = [{transform_indices = @transform_0, window_bounds = array<i64: 16, 128>}, {transform_indices = @transform_1, window_bounds = array<i64: 128, 128>}, {transform_indices = @transform_2, window_bounds = array<i64: 16, 128>}]} {
    %c0_i32 = arith.constant 0 : i32
    %0 = arith.cmpi eq, %arg2, %c0_i32 : i32
    %1 = arith.extui %0 : i1 to i32
    %c0_i32_0 = arith.constant 0 : i32
    %2 = arith.cmpi ne, %1, %c0_i32_0 : i32
    scf.if %2 {
      %cst_8 = arith.constant 0.000000e+00 : f32
      %9 = vector.broadcast %cst_8 : f32 to vector<16x128xf32>
      %c0_9 = arith.constant 0 : index
      %c0_10 = arith.constant 0 : index
      %10 = vector.load %arg5[%c0_9, %c0_10] : memref<16x128xf32, #tpu.memory_space<vmem>>, vector<16x128xf32>
      tpu.vector_store %arg5[%c0_9, %c0_10], %9 {strides = array<i32>} : memref<16x128xf32, #tpu.memory_space<vmem>>, vector<16x128xf32>,
    } else {
    }
    %c0 = arith.constant 0 : index
    %c0_1 = arith.constant 0 : index
    %3 = vector.load %arg5[%c0, %c0_1] : memref<16x128xf32, #tpu.memory_space<vmem>>, vector<16x128xf32>
    %c0_2 = arith.constant 0 : index
    %c0_3 = arith.constant 0 : index
    %4 = vector.load %arg3[%c0_2, %c0_3] : memref<16x128xf32, #tpu.memory_space<vmem>>, vector<16x128xf32>
    %c0_4 = arith.constant 0 : index
    %c0_5 = arith.constant 0 : index
    %5 = vector.load %arg4[%c0_4, %c0_5] : memref<128x128xf32, #tpu.memory_space<vmem>>, vector<128x128xf32>
    %cst = arith.constant dense<0.000000e+00> : vector<16x128xf32>
    %6 = tpu.matmul %4, %5, %cst {dimension_numbers = #tpu.dot_dimension_numbers<[1], [0], [0], [1], [0, 0, 1, 1], [], []>} : vector<16x128xf32>, vector<128x128xf32>, vector<16x128xf32> -> vector<16x128xf32>
    %7 = arith.addf %3, %6 : vector<16x128xf32>
    %c0_6 = arith.constant 0 : index
    %c0_7 = arith.constant 0 : index
    %8 = vector.load %arg5[%c0_6, %c0_7] : memref<16x128xf32, #tpu.memory_space<vmem>>, vector<16x128xf32>
    tpu.vector_store %arg5[%c0_6, %c0_7], %7 {strides = array<i32>} : memref<16x128xf32, #tpu.memory_space<vmem>>, vector<16x128xf32>,
    return
  }
  func.func @transform_0(%arg0: i32, %arg1: i32, %arg2: i32) -> (i32, i32) {
    %c0_i32 = arith.constant 0 : i32
    return %arg0, %arg2 : i32, i32
  }
  func.func @transform_1(%arg0: i32, %arg1: i32, %arg2: i32) -> (i32, i32) {
    %c0_i32 = arith.constant 0 : i32
    return %arg2, %arg1 : i32, i32
  }
  func.func @transform_2(%arg0: i32, %arg1: i32, %arg2: i32) -> (i32, i32) {
    %c0_i32 = arith.constant 0 : i32
    return %arg0, %arg1 : i32, i32
  }
}

</mosaic_0001>

<bundles_post_ra>
// kernel: linear_forward.1
= control target key start
LH: loop header
LB: loop body
LE: loop exit
PB: predicated region body
PF: predicated region fallthrough
CT: control target
= control target key end

     0   :  { %7 = vsyncpa [#allocation3], 0  ;;  %s131_s12 = smov [#allocation2]   ;;  %s132_s14 = smov 128   ;;  %s164_s0 = inlined_call_operand.vmem [shape: f32[16,128], index: 0, kind: input, shape index: {}]   ;;  %s165_s1 = inlined_call_operand.hbm [shape: f32[128,128], index: 1, kind: input, shape index: {}]   ;;  %s166_s2 = inlined_call_operand.vmem [shape: f32[16,128], index: 2, kind: output, shape index: {}]  }
   0x1   :  { %s14_s11 = sshll.u32 %s165_s1, 4  ;;  %s16_s13 = sshll.u32 %s131_s12, 4  ;;  %s15_s11 = int_to_ptr.hbm [resolvable:$true] %s14_s11  ;;  %s17_s13 = int_to_ptr.vmem [resolvable:$true] %s16_s13 }
   0x2   :  { %s133_s15 = smov 8  }
   0x3   :  { %22 = dma.hbm_to_vmem [thread:$0]  %s15_s11, 2048, %s17_s13, [#allocation3], %s132_s14, %s132_s14, %s133_s15  }
   0x4   :  { %129 = dma.done.wait [#allocation3], 2048  }
   0x5   :  { %130 = vsyncadd [#allocation3], 4294965248  ;;  %v52_v0 = vld [vmem:[#allocation2 + $0x78] sm:$0xff]  ;;  %v51_v1 = vld [vmem:[#allocation2 + $0x70] sm:$0xff] }
   0x6   :  { %53 = vmatpush.msra.mxu0 %v52_v0  ;;  %85 = vmatpush.msra.mxu1 %v52_v0  ;;  %v50_v2 = vld [vmem:[#allocation2 + $0x68] sm:$0xff]  ;;  %v49_v3 = vld [vmem:[#allocation2 + $0x60] sm:$0xff]  ;;  %v48_v4 = vld [vmem:[#allocation2 + $0x58] sm:$0xff] }
   0x7   :  { %v47_v5 = vld [vmem:[#allocation2 + $0x50] sm:$0xff]  ;;  %v46_v6 = vld [vmem:[#allocation2 + $0x48] sm:$0xff]  ;;  %v45_v7 = vld [vmem:[#allocation2 + $0x40] sm:$0xff] }
   0x8   :  { %54 = vmatpush.msra.mxu0 %v51_v1  ;;  %86 = vmatpush.msra.mxu1 %v51_v1  ;;  %v44_v8 = vld [vmem:[#allocation2 + $0x38] sm:$0xff]  ;;  %v43_v9 = vld [vmem:[#allocation2 + $0x30] sm:$0xff]  ;;  %v42_v10 = vld [vmem:[#allocation2 + $0x28] sm:$0xff] }
   0x9   :  { %v41_v11 = vld [vmem:[#allocation2 + $0x20] sm:$0xff]  ;;  %v40_v12 = vld [vmem:[#allocation2 + $0x18] sm:$0xff]  ;;  %v39_v13 = vld [vmem:[#allocation2 + $0x10] sm:$0xff] }
   0xa   :  { %55 = vmatpush.msra.mxu0 %v50_v2  ;;  %87 = vmatpush.msra.mxu1 %v50_v2  ;;  %v38_v14 = vld [vmem:[#allocation2 + $0x8] sm:$0xff]  ;;  %v37_v15 = vld [vmem:[#allocation2] sm:$0xff] }
   0xb   :  { %v35_v16 = vld [vmem:[%s164_s0] sm:$0xff]  ;;  %v36_v17 = vld [vmem:[%s164_s0 + $0x8] sm:$0xff] }
   0xc   :  { %56 = vmatpush.msra.mxu0 %v49_v3  ;;  %88 = vmatpush.msra.mxu1 %v49_v3 }
   0xe   :  { %57 = vmatpush.msra.mxu0 %v48_v4  ;;  %89 = vmatpush.msra.mxu1 %v48_v4 }
  0x10   :  { %58 = vmatpush.msra.mxu0 %v47_v5  ;;  %90 = vmatpush.msra.mxu1 %v47_v5 }
  0x12   :  { %59 = vmatpush.msra.mxu0 %v46_v6  ;;  %91 = vmatpush.msra.mxu1 %v46_v6 }
  0x14   :  { %60 = vmatpush.msra.mxu0 %v45_v7  ;;  %92 = vmatpush.msra.mxu1 %v45_v7 }
  0x16   :  { %61 = vmatpush.msra.mxu0 %v44_v8  ;;  %93 = vmatpush.msra.mxu1 %v44_v8 }
  0x18   :  { %62 = vmatpush.msra.mxu0 %v43_v9  ;;  %94 = vmatpush.msra.mxu1 %v43_v9 }
  0x1a   :  { %63 = vmatpush.msra.mxu0 %v42_v10  ;;  %95 = vmatpush.msra.mxu1 %v42_v10 }
  0x1c   :  { %64 = vmatpush.msra.mxu0 %v41_v11  ;;  %96 = vmatpush.msra.mxu1 %v41_v11 }
  0x1e   :  { %65 = vmatpush.msra.mxu0 %v40_v12  ;;  %97 = vmatpush.msra.mxu1 %v40_v12 }
  0x20   :  { %66 = vmatpush.msra.mxu0 %v39_v13  ;;  %98 = vmatpush.msra.mxu1 %v39_v13 }
  0x22   :  { %67 = vmatpush.msra.mxu0 %v38_v14  ;;  %99 = vmatpush.msra.mxu1 %v38_v14 }
  0x24   :  { %68 = vmatpush.msra.mxu0 %v37_v15  ;;  %100 = vmatpush.msra.mxu1 %v37_v15 }
  0x25   :  { %69 = vmatmul.f32.vlgmr.msra.gmra.mxu0 %v35_v16  ;;  %72 = vmatmul.f32.vlgmr.msra.gmra.mxu1 %v36_v17 }
  0xa2   :  { %v70_v18 = vpop.f32.mrf.mxu0  ;;  %v73_v19 = vpop.f32.mrf.mxu1 }
  0xa3   :  { %78 = vst [vmem:[%s166_s2] sm:$0xff] %v70_v18 }
  0xa4   :  { %79 = vst [vmem:[%s166_s2 + $0x8] sm:$0xff] %v73_v19 }
  0xa5   :  { %84 = vsyncpa [#allocation3], 1 }

</bundles_post_ra>
